<compile_context>
chip_gen: v5e
topology: v5e:2x2
jax: 0.10.0
libtpu: 0.0.40
codegen_flags: <defaults>
</compile_context>

<pallas_src>
import functools

import jax
import jax.numpy as jnp
from jax.experimental import pallas as pl
from jax.experimental.pallas import tpu as pltpu


# ----------------------------------------------------------------------------
# Tile / compiler-parameter helpers
# ----------------------------------------------------------------------------
@functools.lru_cache(maxsize=None)
def _mxu_target():
    """Output-tile target: 128 for v5e's 4x128x128 MXU, 256 for v6e/v7x."""
    try:
        kind = jax.devices()[0].device_kind.lower()
    except Exception:
        return 256
    if "v5 lite" in kind or "v5lite" in kind or "v5e" in kind:
        return 128
    return 256


@functools.lru_cache(maxsize=None)
def _vmem_limit_bytes():
    """~75% of physical VMEM (leaves headroom for double buffering)."""
    try:
        cap = getattr(pltpu.get_tpu_info(), "vmem_capacity_bytes", None)
        if cap:
            return min(int(cap * 3 // 4), 128 << 20)
    except Exception:
        pass
    return None


def _compiler_params(dims):
    kwargs = dict(dimension_semantics=dims)
    limit = _vmem_limit_bytes()
    if limit is not None:
        kwargs["vmem_limit_bytes"] = limit
    return pltpu.CompilerParams(**kwargs)


def _tile(dim, target, mult):
    """Largest block <= target that is a multiple of `mult` and divides `dim`.

    Falls back to the full dim, which is always legal (full-extent block
    escape of the (8, 128) rule) and correct, if nothing divides evenly.
    """
    if dim <= target:
        return dim
    t = (target // mult) * mult
    while t >= mult:
        if dim % t == 0:
            return t
        t -= mult
    return dim


# ----------------------------------------------------------------------------
# Pallas kernels
# ----------------------------------------------------------------------------
def _dense_kernel(x_ref, w_ref, b_ref, o_ref, acc_ref, *, activation):
    @pl.when(pl.program_id(2) == 0)
    def _():
        acc_ref[...] = jnp.zeros_like(acc_ref)

    acc_ref[...] += jnp.dot(x_ref[...], w_ref[...],
                            preferred_element_type=jnp.float32)

    @pl.when(pl.program_id(2) == pl.num_programs(2) - 1)
    def _():
        y = acc_ref[...] + b_ref[...].astype(jnp.float32)
        if activation == "gelu":
            y = 0.5 * y * (1.0 + jax.lax.erf(y * 0.7071067811865476))
        elif activation == "tanh":
            y = jnp.tanh(y)
        o_ref[...] = y.astype(o_ref.dtype)


def dense(x, w, b, activation="none", out_dtype=jnp.bfloat16):
    """y = act(x @ w + b).  x:[M,K], w:[K,N] (bf16), b:[1,N] (f32)."""
    M, K = x.shape
    K2, N = w.shape
    assert K == K2 and b.shape == (1, N)
    tgt = _mxu_target()
    tm = _tile(M, tgt, 8)
    tn = _tile(N, tgt, 128)
    tk = _tile(K, 256, 128)          # cap K blocks at 256 (v7x VMEM guidance)
    grid = (M // tm, N // tn, K // tk)
    kernel = functools.partial(_dense_kernel, activation=activation)
    return pl.pallas_call(
        kernel,
        out_shape=jax.ShapeDtypeStruct((M, N), out_dtype),
        grid=grid,
        in_specs=[
            pl.BlockSpec((tm, tk), lambda i, j, k: (i, k)),
            pl.BlockSpec((tk, tn), lambda i, j, k: (k, j)),
            pl.BlockSpec((1, tn), lambda i, j, k: (0, j)),
        ],
        out_specs=pl.BlockSpec((tm, tn), lambda i, j, k: (i, j)),
        scratch_shapes=[pltpu.VMEM((tm, tn), jnp.float32)],
        compiler_params=_compiler_params(("parallel", "parallel", "arbitrary")),
    )(x, w, b)


def _dense_res_ln_kernel(x_ref, w_ref, b_ref, r_ref, g_ref, be_ref, o_ref,
                         acc_ref, *, eps):
    @pl.when(pl.program_id(1) == 0)
    def _():
        acc_ref[...] = jnp.zeros_like(acc_ref)

    acc_ref[...] += jnp.dot(x_ref[...], w_ref[...],
                            preferred_element_type=jnp.float32)

    @pl.when(pl.program_id(1) == pl.num_programs(1) - 1)
    def _():
        y = (acc_ref[...] + b_ref[...].astype(jnp.float32)
             + r_ref[...].astype(jnp.float32))
        mu = jnp.mean(y, axis=-1, keepdims=True)
        var = jnp.mean((y - mu) ** 2, axis=-1, keepdims=True)
        inv = jax.lax.rsqrt(var + eps)
        o_ref[...] = ((y - mu) * inv * g_ref[...].astype(jnp.float32)
                      + be_ref[...].astype(jnp.float32)).astype(o_ref.dtype)


def dense_residual_layernorm(x, w, b, res, gamma, beta, eps=1e-12,
                             out_dtype=jnp.bfloat16):
    """LayerNorm(x @ w + b + res) over the last dim, fused in one kernel."""
    M, K = x.shape
    K2, N = w.shape
    assert K == K2 and res.shape == (M, N)
    tm = _tile(M, _mxu_target(), 8)
    tk = _tile(K, 256, 128)
    grid = (M // tm, K // tk)          # N not tiled: LN needs the full row
    kernel = functools.partial(_dense_res_ln_kernel, eps=eps)
    return pl.pallas_call(
        kernel,
        out_shape=jax.ShapeDtypeStruct((M, N), out_dtype),
        grid=grid,
        in_specs=[
            pl.BlockSpec((tm, tk), lambda i, k: (i, k)),
            pl.BlockSpec((tk, N), lambda i, k: (k, 0)),
            pl.BlockSpec((1, N), lambda i, k: (0, 0)),
            pl.BlockSpec((tm, N), lambda i, k: (i, 0)),   # residual, resident
            pl.BlockSpec((1, N), lambda i, k: (0, 0)),
            pl.BlockSpec((1, N), lambda i, k: (0, 0)),
        ],
        out_specs=pl.BlockSpec((tm, N), lambda i, k: (i, 0)),
        scratch_shapes=[pltpu.VMEM((tm, N), jnp.float32)],
        compiler_params=_compiler_params(("parallel", "arbitrary")),
    )(x, w, b, res, gamma, beta)


def _ln_kernel(x_ref, g_ref, b_ref, o_ref, *, eps):
    xv = x_ref[...].astype(jnp.float32)
    mu = jnp.mean(xv, axis=-1, keepdims=True)
    var = jnp.mean((xv - mu) ** 2, axis=-1, keepdims=True)
    inv = jax.lax.rsqrt(var + eps)
    o_ref[...] = ((xv - mu) * inv * g_ref[...] + b_ref[...]).astype(o_ref.dtype)


def layernorm(x, gamma, beta, eps=1e-12, out_dtype=jnp.bfloat16):
    """Row-tiled LayerNorm over the last dim.  x:[M,H], gamma,beta:[1,H]."""
    M, H = x.shape
    tm = _tile(M, 512, 8)
    grid = (M // tm,)
    kernel = functools.partial(_ln_kernel, eps=eps)
    return pl.pallas_call(
        kernel,
        out_shape=jax.ShapeDtypeStruct((M, H), out_dtype),
        grid=grid,
        in_specs=[
            pl.BlockSpec((tm, H), lambda i: (i, 0)),
            pl.BlockSpec((1, H), lambda i: (0, 0)),
            pl.BlockSpec((1, H), lambda i: (0, 0)),
        ],
        out_specs=pl.BlockSpec((tm, H), lambda i: (i, 0)),
        compiler_params=_compiler_params(("parallel",)),
    )(x, gamma, beta)


def _flash_kernel(q_ref, k_ref, v_ref, m_ref, o_ref, m_sc, l_sc, acc_sc, *,
                  scale):
    kv = pl.program_id(3)

    @pl.when(kv == 0)
    def _():
        m_sc[...] = jnp.full_like(m_sc, -jnp.inf)
        l_sc[...] = jnp.zeros_like(l_sc)
        acc_sc[...] = jnp.zeros_like(acc_sc)

    q = q_ref[0, 0]                                   # (tq, Dh) bf16
    k = k_ref[0, 0]                                   # (tkv, Dh) bf16
    s = jax.lax.dot_general(q, k, (((1,), (1,)), ((), ())),
                            preferred_element_type=jnp.float32) * scale
    s = s + m_ref[0, 0]                               # additive mask (1, tkv)

    m_new = jnp.maximum(m_sc[...], jnp.max(s, axis=-1, keepdims=True))
    alpha = jnp.exp(m_sc[...] - m_new)
    p = jnp.exp(s - m_new)
    l_sc[...] = alpha * l_sc[...] + jnp.sum(p, axis=-1, keepdims=True)
    acc_sc[...] = alpha * acc_sc[...] + jnp.dot(
        p.astype(v_ref.dtype), v_ref[0, 0], preferred_element_type=jnp.float32)
    m_sc[...] = m_new

    @pl.when(kv == pl.num_programs(3) - 1)
    def _():
        out = acc_sc[...] * pl.reciprocal(l_sc[...], approx=True)
        o_ref[...] = out[None, None].astype(o_ref.dtype)


def flash_attention(q, k, v, mask_add, out_dtype=jnp.bfloat16):
    """softmax(q k^T / sqrt(Dh) + mask) v with online softmax (flash-style).

    q,k,v: [B, Hn, S, Dh] (bf16); mask_add: [B, 1, 1, S] additive (0 / -1e9).
    """
    B, Hn, S, Dh = q.shape
    scale = 1.0 / float(Dh) ** 0.5
    tq = _tile(S, 256, 8)
    tkv = _tile(S, 256, 128)      # kv blocks lane-aligned (or full S)
    grid = (B, Hn, S // tq, S // tkv)
    kernel = functools.partial(_flash_kernel, scale=scale)
    return pl.pallas_call(
        kernel,
        out_shape=jax.ShapeDtypeStruct((B, Hn, S, Dh), out_dtype),
        grid=grid,
        in_specs=[
            pl.BlockSpec((1, 1, tq, Dh), lambda b, h, qi, ki: (b, h, qi, 0)),
            pl.BlockSpec((1, 1, tkv, Dh), lambda b, h, qi, ki: (b, h, ki, 0)),
            pl.BlockSpec((1, 1, tkv, Dh), lambda b, h, qi, ki: (b, h, ki, 0)),
            pl.BlockSpec((1, 1, 1, tkv), lambda b, h, qi, ki: (b, 0, 0, ki)),
        ],
        out_specs=pl.BlockSpec((1, 1, tq, Dh), lambda b, h, qi, ki: (b, h, qi, 0)),
        scratch_shapes=[
            pltpu.VMEM((tq, 1), jnp.float32),    # running max
            pltpu.VMEM((tq, 1), jnp.float32),    # running denom
            pltpu.VMEM((tq, Dh), jnp.float32),   # output accumulator
        ],
        compiler_params=_compiler_params(
            ("parallel", "parallel", "parallel", "arbitrary")),
    )(q, k, v, mask_add)


# ----------------------------------------------------------------------------
# Parameter init (deterministic, synthetic).  Matmul weights in bf16.
# ----------------------------------------------------------------------------
def _normal(key, shape, scale=0.02, dtype=jnp.bfloat16):
    return (scale * jax.random.normal(key, shape, dtype=jnp.float32)).astype(dtype)


def init_bert_params(key, vocab, hidden, n_layers, n_heads, inter, max_pos):
    keys = iter(jax.random.split(key, 8 + 8 * n_layers))
    p = {
        "word_emb": _normal(next(keys), (vocab, hidden)),
        "pos_emb": _normal(next(keys), (max_pos, hidden)),
        "type_emb": _normal(next(keys), (2, hidden)),
        "emb_ln_g": jnp.ones((1, hidden), jnp.float32),
        "emb_ln_b": jnp.zeros((1, hidden), jnp.float32),
        "pool_w": _normal(next(keys), (hidden, hidden)),
        "pool_b": jnp.zeros((1, hidden), jnp.float32),
        "layers": [],
        "n_heads": n_heads,
    }
    for _ in range(n_layers):
        layer = {
            # Fused QKV projection weight [H, 3H] laid out as (q | k | v).
            "wqkv": _normal(next(keys), (hidden, 3 * hidden)),
            "bqkv": jnp.zeros((1, 3 * hidden), jnp.float32),
            "wo": _normal(next(keys), (hidden, hidden)),
            "bo": jnp.zeros((1, hidden), jnp.float32),
            "ln1_g": jnp.ones((1, hidden), jnp.float32),
            "ln1_b": jnp.zeros((1, hidden), jnp.float32),
            "w1": _normal(next(keys), (hidden, inter)),
            "b1": jnp.zeros((1, inter), jnp.float32),
            "w2": _normal(next(keys), (inter, hidden)),
            "b2": jnp.zeros((1, hidden), jnp.float32),
            "ln2_g": jnp.ones((1, hidden), jnp.float32),
            "ln2_b": jnp.zeros((1, hidden), jnp.float32),
        }
        p["layers"].append(layer)
    return p


# ----------------------------------------------------------------------------
# Mini-BERT forward (pooler_output) built from Pallas kernels
# ----------------------------------------------------------------------------
def bert_forward(params, input_ids, attention_mask):
    B, S = input_ids.shape
    H = params["word_emb"].shape[1]
    Hn = params["n_heads"]
    Dh = H // Hn
    M = B * S

    # Embedding gather + sum (glue) in f32, LayerNorm in Pallas -> bf16 tokens.
    emb = (params["word_emb"][input_ids].astype(jnp.float32)
           + params["pos_emb"][None, :S, :].astype(jnp.float32)
           + params["type_emb"][0].astype(jnp.float32)[None, None, :])
    x = layernorm(emb.reshape(M, H), params["emb_ln_g"], params["emb_ln_b"])

    mask_add = (1.0 - attention_mask.astype(jnp.float32))[:, None, None, :] * -1e9

    for layer in params["layers"]:
        # Single fused QKV projection: x read once, lane-dense [M, 3H] output.
        qkv = dense(x, layer["wqkv"], layer["bqkv"])
        qkv = qkv.reshape(B, S, 3, Hn, Dh).transpose(2, 0, 3, 1, 4)
        q, k, v = qkv[0], qkv[1], qkv[2]                  # [B, Hn, S, Dh]
        ctx = flash_attention(q, k, v, mask_add)
        ctx = ctx.transpose(0, 2, 1, 3).reshape(M, H)
        # dense(wo) + residual + LayerNorm fused into one kernel.
        x = dense_residual_layernorm(ctx, layer["wo"], layer["bo"],
                                     x, layer["ln1_g"], layer["ln1_b"])
        h1 = dense(x, layer["w1"], layer["b1"], activation="gelu")
        # dense(w2) + residual + LayerNorm fused into one kernel.
        x = dense_residual_layernorm(h1, layer["w2"], layer["b2"],
                                     x, layer["ln2_g"], layer["ln2_b"])

    cls = x.reshape(B, S, H)[:, 0, :]                     # [B, H] CLS token
    pooled = dense(cls, params["pool_w"], params["pool_b"],
                   activation="tanh", out_dtype=jnp.float32)
    return pooled                                         # pooler_output [B, H]


# ----------------------------------------------------------------------------
# MultitaskBERT (JAX/Pallas version of the PyTorch module)
# ----------------------------------------------------------------------------
class MultitaskBERT:
    def __init__(self, config, key):
        keys = jax.random.split(key, 6)
        self.bert_en = init_bert_params(keys[0], config["vocab_en"],
                                        config["hidden_size"], config["num_layers"],
                                        config["num_heads"], config["intermediate"],
                                        config["max_pos"])
        self.bert_fr = init_bert_params(keys[1], config["vocab_fr"],
                                        config["hidden_size"], config["num_layers"],
                                        config["num_heads"], config["intermediate"],
                                        config["max_pos"])
        H = config["hidden_size"]
        nl = len(config["num_labels"])
        # Tiny classifier heads stay in plain jnp (output widths 1/2/5 would be
        # lane-masked Pallas stores dominated by launch overhead).
        self.w_sent_en = _normal(keys[2], (H, nl), dtype=jnp.float32)
        self.b_sent_en = jnp.zeros((nl,), jnp.float32)
        self.w_sent_fr = _normal(keys[3], (H, 2), dtype=jnp.float32)
        self.b_sent_fr = jnp.zeros((2,), jnp.float32)
        self.w_para = _normal(keys[4], (2 * H, 1), dtype=jnp.float32)
        self.b_para = jnp.zeros((1,), jnp.float32)
        self.w_sim = _normal(keys[5], (2 * H, 1), dtype=jnp.float32)
        self.b_sim = jnp.zeros((1,), jnp.float32)
        # Dropout is identity at inference (eval mode); hidden_dropout_prob unused.

    def forward(self, input_ids, attention_mask, lang):
        params = self.bert_en if lang == "en" else self.bert_fr
        return bert_forward(params, input_ids, attention_mask)

    def predict_sentiment(self, input_ids, attention_mask):
        pooled = self.forward(input_ids, attention_mask, lang="en")
        return pooled @ self.w_sent_en + self.b_sent_en            # [B, 5]

    def predict_sentiment_fr(self, input_ids, attention_mask):
        pooled = self.forward(input_ids, attention_mask, lang="fr")
        return pooled @ self.w_sent_fr + self.b_sent_fr            # [B, 2]

    def _pair(self, ids1, m1, ids2, m2, lang, w, b):
        p1 = self.forward(ids1, m1, lang)
        p2 = self.forward(ids2, m2, lang)
        combined = jnp.concatenate([p1, p2], axis=1)               # [B, 2H]
        return combined @ w + b                                    # [B, 1]

    def predict_paraphrase(self, ids1, m1, ids2, m2):
        return self._pair(ids1, m1, ids2, m2, "en", self.w_para, self.b_para)

    def predict_paraphrase_fr(self, ids1, m1, ids2, m2):
        return self._pair(ids1, m1, ids2, m2, "fr", self.w_para, self.b_para)

    def predict_similarity(self, ids1, m1, ids2, m2):
        return self._pair(ids1, m1, ids2, m2, "en", self.w_sim, self.b_sim)

    def predict_similarity_fr(self, ids1, m1, ids2, m2):
        return self._pair(ids1, m1, ids2, m2, "fr", self.w_sim, self.b_sim)


# ----------------------------------------------------------------------------
if __name__ == "__main__":
    config = dict(
        hidden_size=32,
        num_layers=2,
        num_heads=2,
        intermediate=64,
        max_pos=16,
        vocab_en=64,
        vocab_fr=64,
        num_labels=[0, 1, 2, 3, 4],   # 5 sentiment classes
        hidden_dropout_prob=0.1,
    )
    B, S = 2, 8

    key = jax.random.PRNGKey(0)
    k_model, k_ids1, k_ids2 = jax.random.split(key, 3)

    model = MultitaskBERT(config, k_model)

    ids1 = jax.random.randint(k_ids1, (B, S), 0, config["vocab_en"], dtype=jnp.int32)
    ids2 = jax.random.randint(k_ids2, (B, S), 0, config["vocab_en"], dtype=jnp.int32)
    mask1 = jnp.ones((B, S), jnp.int32).at[1, 6:].set(0)   # second sentence padded
    mask2 = jnp.ones((B, S), jnp.int32)

    pooled_en = model.forward(ids1, mask1, lang="en")
    pooled_fr = model.forward(ids1, mask1, lang="fr")
    sent = model.predict_sentiment(ids1, mask1)
    sent_fr = model.predict_sentiment_fr(ids1, mask1)
    para = model.predict_paraphrase(ids1, mask1, ids2, mask2)
    sim = model.predict_similarity(ids1, mask1, ids2, mask2)
    para_fr = model.predict_paraphrase_fr(ids1, mask1, ids2, mask2)
    sim_fr = model.predict_similarity_fr(ids1, mask1, ids2, mask2)

    for out, shape in [
        (pooled_en, (B, 32)), (pooled_fr, (B, 32)),
        (sent, (B, 5)), (sent_fr, (B, 2)),
        (para, (B, 1)), (sim, (B, 1)), (para_fr, (B, 1)), (sim_fr, (B, 1)),
    ]:
        jax.block_until_ready(out)
        assert out.shape == shape, (out.shape, shape)
        assert bool(jnp.all(jnp.isfinite(out.astype(jnp.float32))))

    print("KERNEL_OK")
</pallas_src>

<mosaic_0001>
module attributes {stable_mosaic.version = 11 : i64} {
  func.func @_ln_kernel(%arg0: i32, %arg1: memref<16x32xf32, #tpu.memory_space<vmem>>, %arg2: memref<1x32xf32, #tpu.memory_space<vmem>>, %arg3: memref<1x32xf32, #tpu.memory_space<vmem>>, %arg4: memref<16x32xbf16, #tpu.memory_space<vmem>>) attributes {dimension_semantics = [#tpu.dimension_semantics<parallel>], iteration_bounds = array<i64: 1>, scalar_prefetch = 0 : i64, scratch_operands = 0 : i64, tpu.core_type = #tpu.core_type<tc>, window_params = [{transform_indices = @transform_0, window_bounds = array<i64: 16, 32>}, {pipeline_mode = #tpu.pipeline_mode<synchronous>, transform_indices = @transform_1, window_bounds = array<i64: 1, 32>}, {pipeline_mode = #tpu.pipeline_mode<synchronous>, transform_indices = @transform_2, window_bounds = array<i64: 1, 32>}, {transform_indices = @transform_3, window_bounds = array<i64: 16, 32>}]} {
    %c0 = arith.constant 0 : index
    %c0_0 = arith.constant 0 : index
    %0 = vector.load %arg1[%c0, %c0_0] : memref<16x32xf32, #tpu.memory_space<vmem>>, vector<16x32xf32>
    %cst = arith.constant dense<0.000000e+00> : vector<16xf32>
    %1 = vector.multi_reduction <add>, %0, %cst [1] : vector<16x32xf32> to vector<16xf32>
    %2 = vector.shape_cast %1 : vector<16xf32> to vector<16x1xf32>
    %cst_1 = arith.constant 3.200000e+01 : f32
    %3 = vector.broadcast %cst_1 : f32 to vector<16x1xf32>
    %4 = arith.divf %2, %3 : vector<16x1xf32>
    %5 = vector.broadcast %4 : vector<16x1xf32> to vector<16x32xf32>
    %6 = arith.subf %0, %5 : vector<16x32xf32>
    %7 = arith.mulf %6, %6 : vector<16x32xf32>
    %cst_2 = arith.constant dense<0.000000e+00> : vector<16xf32>
    %8 = vector.multi_reduction <add>, %7, %cst_2 [1] : vector<16x32xf32> to vector<16xf32>
    %9 = vector.shape_cast %8 : vector<16xf32> to vector<16x1xf32>
    %cst_3 = arith.constant 3.200000e+01 : f32
    %10 = vector.broadcast %cst_3 : f32 to vector<16x1xf32>
    %11 = arith.divf %9, %10 : vector<16x1xf32>
    %cst_4 = arith.constant 9.99999996E-13 : f32
    %12 = vector.broadcast %cst_4 : f32 to vector<16x1xf32>
    %13 = arith.addf %11, %12 : vector<16x1xf32>
    %14 = math.rsqrt %13 : vector<16x1xf32>
    %15 = vector.broadcast %4 : vector<16x1xf32> to vector<16x32xf32>
    %16 = arith.subf %0, %15 : vector<16x32xf32>
    %17 = vector.broadcast %14 : vector<16x1xf32> to vector<16x32xf32>
    %18 = arith.mulf %16, %17 : vector<16x32xf32>
    %c0_5 = arith.constant 0 : index
    %c0_6 = arith.constant 0 : index
    %19 = vector.load %arg2[%c0_5, %c0_6] : memref<1x32xf32, #tpu.memory_space<vmem>>, vector<1x32xf32>
    %20 = vector.broadcast %19 : vector<1x32xf32> to vector<16x32xf32>
    %21 = arith.mulf %18, %20 : vector<16x32xf32>
    %c0_7 = arith.constant 0 : index
    %c0_8 = arith.constant 0 : index
    %22 = vector.load %arg3[%c0_7, %c0_8] : memref<1x32xf32, #tpu.memory_space<vmem>>, vector<1x32xf32>
    %23 = vector.broadcast %22 : vector<1x32xf32> to vector<16x32xf32>
    %24 = arith.addf %21, %23 : vector<16x32xf32>
    %25 = arith.truncf %24 : vector<16x32xf32> to vector<16x32xbf16>
    %c0_9 = arith.constant 0 : index
    %c0_10 = arith.constant 0 : index
    %26 = vector.load %arg4[%c0_9, %c0_10] : memref<16x32xbf16, #tpu.memory_space<vmem>>, vector<16x32xbf16>
    tpu.vector_store %arg4[%c0_9, %c0_10], %25 {strides = array<i32>} : memref<16x32xbf16, #tpu.memory_space<vmem>>, vector<16x32xbf16>,
    return
  }
  func.func @transform_0(%arg0: i32) -> (i32, i32) {
    %c0_i32 = arith.constant 0 : i32
    %c0_i32_0 = arith.constant 0 : i32
    return %arg0, %c0_i32 : i32, i32
  }
  func.func @transform_1(%arg0: i32) -> (i32, i32) {
    %c0_i32 = arith.constant 0 : i32
    %c0_i32_0 = arith.constant 0 : i32
    %c0_i32_1 = arith.constant 0 : i32
    return %c0_i32, %c0_i32_0 : i32, i32
  }
  func.func @transform_2(%arg0: i32) -> (i32, i32) {
    %c0_i32 = arith.constant 0 : i32
    %c0_i32_0 = arith.constant 0 : i32
    %c0_i32_1 = arith.constant 0 : i32
    return %c0_i32, %c0_i32_0 : i32, i32
  }
  func.func @transform_3(%arg0: i32) -> (i32, i32) {
    %c0_i32 = arith.constant 0 : i32
    %c0_i32_0 = arith.constant 0 : i32
    return %arg0, %c0_i32 : i32, i32
  }
}

</mosaic_0001>

<bundles_post_ra>
// kernel: tpu_custom_call.1
= control target key start
LH: loop header
LB: loop body
LE: loop exit
PB: predicated region body
PF: predicated region fallthrough
CT: control target
= control target key end

     0   :  { %8 = vsyncpa [#allocation3], 0  ;;  %s274_s0 = inlined_call_operand.hbm [shape: f32[16,32], index: 0, kind: input, shape index: {}]   ;;  %s275_s1 = inlined_call_operand.hbm [shape: f32[1,32], index: 1, kind: input, shape index: {}]   ;;  %s276_s2 = inlined_call_operand.vmem [shape: f32[1,32], index: 2, kind: input, shape index: {}]   ;;  %s277_s3 = inlined_call_operand.hbm [shape: bf16[16,32], index: 3, kind: output, shape index: {}]  }
   0x1   :  { %9 = vsyncpa [#allocation6], 0 }
   0x2   :  { %10 = vsyncpa [#allocation4], 0  ;;  %s15_s14 = sshll.u32 %s274_s0, 4  ;;  %s230_s15 = smov [#allocation2]   ;;  %s16_s14 = int_to_ptr.hbm [resolvable:$true] %s15_s14 }
   0x3   :  { %s17_s16 = sshll.u32 %s230_s15, 4  ;;  %s29_s19 = sshll.u32 %s275_s1, 4  ;;  %s18_s16 = int_to_ptr.vmem [resolvable:$true] %s17_s16  ;;  %s30_s19 = int_to_ptr.hbm [resolvable:$true] %s29_s19 }
   0x4   :  { %s231_s20 = smov 128   ;;  %s232_s21 = smov 8  }
   0x5   :  { %23 = dma.hbm_to_vmem [thread:$0]  %s16_s14, 256, %s18_s16, [#allocation3], %s231_s20, %s231_s20, %s232_s21  }
   0x6   :  { %s233_s22 = smov [#allocation5]  }
   0x7   :  { %s31_s23 = sshll.u32 %s233_s22, 4  ;;  %s32_s23 = int_to_ptr.vmem [resolvable:$true] %s31_s23 }
   0x8   :  { %34 = dma.hbm_to_vmem [thread:$0]  %s30_s19, 16, %s32_s23, [#allocation6]  }
   0x9   :  { %224 = dma.done.wait [#allocation3], 256  }
   0xa   :  { %225 = vsyncadd [#allocation3], 4294967040 }
   0xb   :  { %226 = dma.done.wait [#allocation6], 16  }
   0xc   :  { %227 = vsyncadd [#allocation6], 4294967280  ;;  %vm47_vm0 = vcmask 261120   ;;  %v45_v0 = vld [vmem:[#allocation2] sm:$0xff]  ;;  %v46_v2 = vld [vmem:[#allocation2 + $0x8] sm:$0xff]  ;;  %v234_v4 = vmov 32.0  }
   0xd   :  { %v48_v1 = vsel %vm47_vm0, %v45_v0, 0.0  ;;  %v51_v3 = vsel %vm47_vm0, %v46_v2, 0.0  ;;  %146 = vrcp.f32 %v234_v4  ;;  %v144_v35 = vld [vmem:[#allocation5] ss:$0 sm:$0xff]  ;;  %v145_v38 = vld [vmem:[%s276_s2] ss:$0 sm:$0xff] }
   0xe   :  { %49 = vadd.xlane.f32.xlu0 %v48_v1  ;;  %vm113_vm7 = vcmask 257024   ;;  %s235_s24 = smov [#allocation7]   ;;  %s122_s2 = sshll.u32 %s277_s3, 4  ;;  %s123_s2 = int_to_ptr.hbm [resolvable:$true] %s122_s2 }
   0xf   :  { %s120_s25 = sshll.u32 %s235_s24, 4  ;;  %s236_s28 = smov 64   ;;  %s121_s25 = int_to_ptr.vmem [resolvable:$true] %s120_s25 }
  0x10   :  { %s237_s29 = smov 4  }
  0x13   :  { %v147_v5 = vpop.eup %146 }
  0x14   :  { %v55_v6 = vmul.f32 32.0, %v147_v5  ;;  %vm59_vm1 = vweird.f32 %v147_v5 }
  0x16   :  { %52 = vadd.xlane.f32.xlu0 %v51_v3  ;;  %v56_v7 = vsub.f32 1.0, %v55_v6 }
  0x18   :  { %v57_v8 = vmul.f32 %v147_v5, %v56_v7 }
  0x1a   :  { %v58_v9 = vadd.f32 %v147_v5, %v57_v8 }
  0x1c   :  { %v60_v10 = vsel %vm59_vm1, %v147_v5, %v58_v9 }
  0x81   :  { %v50_v11 = vpop.xlane.xlu0 %49 }
  0x82   :  { %v61_v12 = vmul.f32 %v60_v10, %v50_v11 }
  0x84   :  { %v63_v13 = vsub.f32 %v45_v0, %v61_v12 }
  0x86   :  { %v65_v14 = vmul.f32 %v63_v13, %v63_v13 }
  0x88   :  { %v67_v15 = vsel %vm47_vm0, %v65_v14, 0.0 }
  0x89   :  { %68 = vadd.xlane.f32.xlu1 %v67_v15  ;;  %v53_v16 = vpop.xlane.xlu0 %52 }
  0x8a   :  { %v62_v17 = vmul.f32 %v60_v10, %v53_v16 }
  0x8c   :  { %v64_v18 = vsub.f32 %v46_v2, %v62_v17 }
  0x8e   :  { %v66_v19 = vmul.f32 %v64_v18, %v64_v18 }
  0x90   :  { %v70_v20 = vsel %vm47_vm0, %v66_v19, 0.0 }
  0x91   :  { %71 = vadd.xlane.f32.xlu1 %v70_v20 }
  0xfc   :  { %v69_v21 = vpop.xlane.xlu1 %68 }
  0xfd   :  { %v73_v22 = vmul.f32 %v69_v21, %v60_v10 }
  0xff   :  { %v75_v23 = vadd.f32 1e-12, %v73_v22 }
 0x101   :  { %148 = vrsqrt.f32 %v75_v23  ;;  %vm83_vm3 = vweird.f32 %v75_v23 }
 0x104   :  { %v72_v24 = vpop.xlane.xlu1 %71 }
 0x105   :  { %v74_v25 = vmul.f32 %v72_v24, %v60_v10 }
 0x107   :  { %v149_v26 = vpop.eup %148  ;;  %v76_v27 = vadd.f32 1e-12, %v74_v25 }
 0x108   :  { %v78_v28 = vmul.f32 %v149_v26, %v75_v23  ;;  %vm84_vm2 = vweird.f32 %v149_v26 }
 0x109   :  { %150 = vrsqrt.f32 %v76_v27  ;;  %vm85_vm4 = vmor %vm83_vm3, %vm84_vm2  ;;  %vm93_vm6 = vweird.f32 %v76_v27 }
 0x10a   :  { %v79_v29 = vmul.f32 %v149_v26, %v78_v28 }
 0x10c   :  { %v80_v30 = vmul.f32 0.5, %v79_v29 }
 0x10e   :  { %v81_v31 = vsub.f32 1.5, %v80_v30 }
 0x10f   :  { %v151_v32 = vpop.eup %150 }
 0x110   :  { %v82_v33 = vmul.f32 %v149_v26, %v81_v31  ;;  %v88_v34 = vmul.f32 %v151_v32, %v76_v27  ;;  %vm94_vm5 = vweird.f32 %v151_v32 }
 0x111   :  { %vm95_vm8 = vmor %vm93_vm6, %vm94_vm5 }
 0x112   :  { %v86_v36 = vsel %vm85_vm4, %v149_v26, %v82_v33  ;;  %v89_v37 = vmul.f32 %v151_v32, %v88_v34 }
 0x113   :  { %v97_v39 = vmul.f32 %v86_v36, %v63_v13 }
 0x114   :  { %v90_v40 = vmul.f32 0.5, %v89_v37 }
 0x115   :  { %v103_v41 = vmul.f32 %v144_v35, %v97_v39 }
 0x116   :  { %v91_v42 = vsub.f32 1.5, %v90_v40 }
 0x117   :  { %v109_v43 = vadd.f32 %v145_v38, %v103_v41 }
 0x118   :  { %v92_v44 = vmul.f32 %v151_v32, %v91_v42 }
 0x119   :  { %v111_v45 = vpack.c.bf16 %v109_v43, %v109_v43 }
 0x11a   :  { %v96_v46 = vsel %vm95_vm8, %v151_v32, %v92_v44 }
 0x11b   :  { %v98_v47 = vmul.f32 %v96_v46, %v64_v18  ;;  %114 = vst.msk [vmem:[#allocation7] sm:$0xf] %vm113_vm7, %v111_v45 }
 0x11d   :  { %v104_v48 = vmul.f32 %v144_v35, %v98_v47 }
 0x11f   :  { %v110_v49 = vadd.f32 %v145_v38, %v104_v48 }
 0x121   :  { %v112_v50 = vpack.c.bf16 %v110_v49, %v110_v49 }
 0x123   :  { %115 = vst.msk [vmem:[#allocation7 + $0x4] sm:$0xf] %vm113_vm7, %v112_v50 }
 0x124   :  { %128 = dma.vmem_to_hbm [thread:$0]  %s121_s25, 128, %s123_s2, [#allocation4], %s236_s28, %s236_s28, %s237_s29  }
 0x125   :  { %228 = dma.done.wait [#allocation4], 128  }
 0x126   :  { %229 = vsyncadd [#allocation4], 4294967168 }
 0x127   :  { %133 = vsyncpa [#allocation3], 1 }
 0x128   :  { %134 = vsyncpa [#allocation6], 1 }
 0x129   :  { %135 = vsyncpa [#allocation4], 1 }

</bundles_post_ra>
